<compile_context>
chip_gen: v7x
topology: tpu7x:2x2x1
jax: 0.10.0
libtpu: 0.0.40
codegen_flags: <defaults>
</compile_context>

<pallas_src>
import jax
import jax.numpy as jnp
from jax.experimental import pallas as pl
from jax.experimental.pallas import tpu as pltpu

# Preferred lane-dense slab widths (last dim of the 2-D view), widest first.
_WIDE_CANDIDATES = (8192, 4096, 2048, 1024, 512, 256, 128)

# Force at least this many grid steps once the slab exceeds this many bytes,
# so the pipeline (and dual-TC sharding on v7x) has work to overlap.
_MIN_STEPS = 4
_MIN_SPLIT_BYTES = 512 * 1024


def _scale_kernel(s_ref, x_ref, o_ref):
    # s_ref: (1,) f32 scalar in SMEM; x_ref / o_ref: VMEM tiles (1-D or 2-D).
    o_ref[...] = (x_ref[...] * s_ref[0]).astype(o_ref.dtype)


def _round_up(x, m):
    return ((x + m - 1) // m) * m


def _round_down(x, m):
    return (x // m) * m


def _chip_config():
    """Returns (block_bytes, vmem_limit_bytes or None) for this TPU generation."""
    kind = ""
    try:
        kind = jax.devices()[0].device_kind.lower()
    except Exception:
        pass
    if "v7" in kind or "tpu7" in kind:
        # v7x: 64 MiB physical VMEM / 32 MiB scoped default. 6 MiB blocks ->
        # double-buffered in+out = 24 MiB; raise the scoped limit explicitly
        # but stay well under the physical ceiling.
        return 6 * 1024 * 1024, 48 * 1024 * 1024
    if "v6" in kind:
        # v6e: 128 MiB physical VMEM. 8 MiB blocks (32 MiB pipeline) with an
        # explicit 64 MiB scoped limit leaves ample headroom.
        return 8 * 1024 * 1024, 64 * 1024 * 1024
    # v5e / unknown: 2 MiB blocks (8 MiB pipeline) fit the 16 MiB scoped
    # default with no flag override; larger blocks buy nothing at ~820 GB/s.
    return 2 * 1024 * 1024, None


def _cost_estimate(n, itemsize):
    return pl.CostEstimate(flops=n, transcendentals=0,
                           bytes_accessed=2 * n * itemsize + 4)


def _compiler_params(vmem_limit):
    return pltpu.CompilerParams(dimension_semantics=("parallel",),
                                vmem_limit_bytes=vmem_limit)


def _run_scale_2d(x2d, scale, block_bytes, vmem_limit, donate_input):
    rows, wide = x2d.shape
    itemsize = jnp.dtype(x2d.dtype).itemsize
    total_bytes = rows * wide * itemsize

    # Rows per block: cap block bytes at the per-generation budget, keep the
    # sublane (row) block a multiple of 8 unless it spans the full extent.
    max_rows = max(8, _round_down(block_bytes // (wide * itemsize), 8))
    row_block = rows if rows <= max_rows else max_rows

    # Guarantee a few grid steps for mid/large slabs (pipelining + dual-TC).
    if total_bytes > _MIN_SPLIT_BYTES and rows >= _MIN_STEPS * 8:
        target = max(8, _round_down(pl.cdiv(rows, _MIN_STEPS), 8))
        row_block = min(row_block, target)

    grid = (pl.cdiv(rows, row_block),)

    return pl.pallas_call(
        _scale_kernel,
        out_shape=jax.ShapeDtypeStruct((rows, wide), x2d.dtype),
        grid=grid,
        in_specs=[
            pl.BlockSpec(memory_space=pltpu.SMEM),               # scalar param
            pl.BlockSpec((row_block, wide), lambda i: (i, 0)),   # data tile
        ],
        out_specs=pl.BlockSpec((row_block, wide), lambda i: (i, 0)),
        compiler_params=_compiler_params(vmem_limit),
        cost_estimate=_cost_estimate(rows * wide, itemsize),
        input_output_aliases={1: 0} if donate_input else {},
    )(scale, x2d)


def _run_scale_1d(flat, scale, block_bytes, vmem_limit, donate_input):
    # Ragged flat length (not a multiple of 128): 1-D lane-dense blocks
    # (multiple of 8*128 elements) with a cdiv grid; Pallas boundary masking
    # handles the partial tail block, so no jnp.pad / slice HBM round trips.
    (n,) = flat.shape
    itemsize = jnp.dtype(flat.dtype).itemsize

    blk = max(1024, _round_down(block_bytes // itemsize, 1024))
    blk = min(blk, _round_up(n, 1024))
    if n * itemsize > _MIN_SPLIT_BYTES:
        blk = min(blk, max(1024, _round_up(pl.cdiv(n, _MIN_STEPS), 1024)))

    grid = (pl.cdiv(n, blk),)

    return pl.pallas_call(
        _scale_kernel,
        out_shape=jax.ShapeDtypeStruct((n,), flat.dtype),
        grid=grid,
        in_specs=[
            pl.BlockSpec(memory_space=pltpu.SMEM),
            pl.BlockSpec((blk,), lambda i: (i,)),
        ],
        out_specs=pl.BlockSpec((blk,), lambda i: (i,)),
        compiler_params=_compiler_params(vmem_limit),
        cost_estimate=_cost_estimate(n, itemsize),
        input_output_aliases={1: 0} if donate_input else {},
    )(scale, flat)


def scale_forward(x, scale, *, donate_input=False):
    """Elementwise x * scale (scale is a shape-(1,) float32 parameter).

    Set donate_input=True only when the caller no longer needs `x`; it lets
    XLA reuse the input HBM buffer for the output.
    """
    assert jnp.issubdtype(x.dtype, jnp.floating), "Scale expects float inputs"
    orig_shape = x.shape
    n = x.size
    block_bytes, vmem_limit = _chip_config()

    # Widest lane dim that divides the flat length AND leaves >= 8 rows
    # (full sublanes -> no masked vector loads/stores); otherwise any divisor.
    wide = None
    for w in _WIDE_CANDIDATES:
        if n % w == 0 and n // w >= 8:
            wide = w
            break
    if wide is None:
        for w in _WIDE_CANDIDATES:
            if n % w == 0:
                wide = w
                break

    # TODO(synk): for production, fuse this scale into the producer/consumer
    # kernel (or alias buffers at the graph level) so this standalone
    # read+write HBM pass disappears entirely.
    if wide is not None:
        x2d = x.reshape(n // wide, wide)            # free contiguous reshape
        out2d = _run_scale_2d(x2d, scale, block_bytes, vmem_limit, donate_input)
        return out2d.reshape(orig_shape)

    # Flat length not a multiple of 128: ragged 1-D path (in-kernel masking).
    out = _run_scale_1d(x.reshape(-1), scale, block_bytes, vmem_limit,
                        donate_input)
    return out.reshape(orig_shape)


if __name__ == "__main__":
    key = jax.random.PRNGKey(0)

    # Deterministic parameter init, matching nn.Parameter(FloatTensor([0.001]))
    init_value = 0.001
    scale_param = jnp.array([init_value], dtype=jnp.float32)

    # Small NCHW input consistent with the module's usage.
    x = jax.random.normal(key, (2, 4, 16, 16), dtype=jnp.float32)

    out = scale_forward(x, scale_param)
    out = jax.block_until_ready(out)

    # Reference check against plain JAX.
    ref = x * scale_param[0]
    assert out.shape == x.shape and out.dtype == x.dtype
    assert jnp.allclose(out, ref, rtol=1e-6, atol=1e-6)

    print("KERNEL_OK")
</pallas_src>

<mosaic_0001>
module attributes {stable_mosaic.version = 11 : i64} {
  func.func @_scale_kernel(%arg0: i32, %arg1: memref<1xf32, #tpu.memory_space<smem>>, %arg2: memref<8x256xf32, #tpu.memory_space<vmem>>, %arg3: memref<8x256xf32, #tpu.memory_space<vmem>>) attributes {dimension_semantics = [#tpu.dimension_semantics<parallel>], iteration_bounds = array<i64: 1>, scalar_prefetch = 0 : i64, scratch_operands = 0 : i64, tpu.core_type = #tpu.core_type<tc>, window_params = [{transform_indices = @transform_0, window_bounds = array<i64: 1>}, {transform_indices = @transform_1, window_bounds = array<i64: 8, 256>}, {transform_indices = @transform_2, window_bounds = array<i64: 8, 256>}]} {
    %c0 = arith.constant 0 : index
    %c0_0 = arith.constant 0 : index
    %0 = vector.load %arg2[%c0, %c0_0] : memref<8x256xf32, #tpu.memory_space<vmem>>, vector<8x256xf32>
    %c0_1 = arith.constant 0 : index
    %1 = memref.load %arg1[%c0_1] : memref<1xf32, #tpu.memory_space<smem>>
    %2 = vector.broadcast %1 : f32 to vector<8x256xf32>
    %3 = arith.mulf %0, %2 : vector<8x256xf32>
    %c0_2 = arith.constant 0 : index
    %c0_3 = arith.constant 0 : index
    %4 = vector.load %arg3[%c0_2, %c0_3] : memref<8x256xf32, #tpu.memory_space<vmem>>, vector<8x256xf32>
    tpu.vector_store %arg3[%c0_2, %c0_3], %3 {strides = array<i32>} : memref<8x256xf32, #tpu.memory_space<vmem>>, vector<8x256xf32>,
    return
  }
  func.func @transform_0(%arg0: i32) -> i32 {
    %c0_i32 = arith.constant 0 : i32
    %c0_i32_0 = arith.constant 0 : i32
    return %c0_i32 : i32
  }
  func.func @transform_1(%arg0: i32) -> (i32, i32) {
    %c0_i32 = arith.constant 0 : i32
    %c0_i32_0 = arith.constant 0 : i32
    return %arg0, %c0_i32 : i32, i32
  }
  func.func @transform_2(%arg0: i32) -> (i32, i32) {
    %c0_i32 = arith.constant 0 : i32
    %c0_i32_0 = arith.constant 0 : i32
    return %arg0, %c0_i32 : i32, i32
  }
}

</mosaic_0001>

<bundles_post_ra>
// kernel: tpu_custom_call.1
= control target key start
LH: loop header
LB: loop body
LE: loop exit
PB: predicated region body
PF: predicated region fallthrough
CT: control target
= control target key end

     0   :  { %8 = vsyncpa [#allocation4], 0  ;;  %s142_s0 = inlined_call_operand.<no memory space> [shape: f32[1], index: 0, kind: input, shape index: {}]   ;;  %s143_s1 = inlined_call_operand.hbm [shape: f32[8,256], index: 1, kind: input, shape index: {}]   ;;  %s144_s2 = inlined_call_operand.hbm [shape: f32[8,256], index: 2, kind: output, shape index: {}]  }
   0x1   :  { %9 = vsyncpa [#allocation5], 0  ;;  %s98_s9 = smov [#allocation3]   ;;  %s50_s13 = scalar_lea.hbm %s143_s1, 256 }
   0x2   :  { %s18_s10 = sshll.u32 %s98_s9, 4  ;;  %p51_p0 = scmp.ne.s32.totalorder %s143_s1, %s50_s13  ;;  %s19_s10 = int_to_ptr.vmem [resolvable:$true] %s18_s10 }
   0x3   :  { %p54_p1 = scmp.lt.u32.totalorder %s50_s13, %s143_s1 }
   0x5   :  { %p56_p2 = pnand %p54_p1, %p51_p0 }
   0x7   :  { %59 = shalt.err (!%p56_p2)
}
   0x8   :  { %s60_s18 = scalar_lea.vmem %s19_s10, 256  ;;  %p65_p4 = scmp.lt.s32.totalorder %s19_s10, %s19_s10 }
   0x9   :  { %p61_p3 = scmp.ne.s32.totalorder %s19_s10, %s60_s18  ;;  %p66_p5 = scmp.lt.s32.totalorder %s60_s18, %s60_s18 }
   0xb   :  { %p67_p6 = por %p66_p5, %p65_p4 }
   0xd   :  { %p68_p7 = pnand %p67_p6, %p61_p3 }
   0xf   :  { %71 = shalt.err (!%p68_p7)
}
  0x10   :  { %21 = dma.hbm_to_vmem [thread:$0]  %s143_s1, 256, %s19_s10, [#allocation4]  }
  0x11   :  { %94 = dma.done.wait [#allocation4], 256  }
  0x12   :  { %95 = vsyncadd [#allocation4], 4294967040  ;;  %v28_v0 = vstv %s142_s0  ;;  %s99_s23 = smov [#allocation6]   ;;  %v25_v1 = vld [vmem:[#allocation3] sm:$0xff]  ;;  %v26_v2 = vld [vmem:[#allocation3 + $0x8] sm:$0xff] }
  0x13   :  { %s39_s24 = sshll.u32 %s99_s23, 4  ;;  %v29_v3 = vmul.f32 %v28_v0, %v25_v1  ;;  %v30_v4 = vmul.f32 %v28_v0, %v26_v2  ;;  %s40_s24 = int_to_ptr.vmem [resolvable:$true] %s39_s24 }
  0x14   :  { %s72_s25 = scalar_lea.vmem %s40_s24, 256  ;;  %p77_p9 = scmp.lt.s32.totalorder %s40_s24, %s40_s24 }
  0x15   :  { %31 = vst [vmem:[#allocation6] sm:$0xff] %v29_v3  ;;  %32 = vst [vmem:[#allocation6 + $0x8] sm:$0xff] %v30_v4  ;;  %p73_p8 = scmp.ne.s32.totalorder %s40_s24, %s72_s25  ;;  %p78_p10 = scmp.lt.s32.totalorder %s72_s25, %s72_s25 }
  0x17   :  { %p79_p11 = por %p78_p10, %p77_p9 }
  0x19   :  { %p80_p12 = pnand %p79_p11, %p73_p8 }
  0x1b   :  { %83 = shalt.err (!%p80_p12)
}
  0x1c   :  { %s84_s0 = scalar_lea.hbm %s144_s2, 256 }
  0x1d   :  { %p85_p13 = scmp.ne.s32.totalorder %s144_s2, %s84_s0  ;;  %p88_p0 = scmp.lt.u32.totalorder %s84_s0, %s144_s2 }
  0x1f   :  { %p90_p1 = pnand %p88_p0, %p85_p13 }
  0x21   :  { %93 = shalt.err (!%p90_p1)
}
  0x22   :  { %42 = dma.vmem_to_hbm [thread:$0]  %s40_s24, 256, %s144_s2, [#allocation5]  }
  0x23   :  { %96 = dma.done.wait [#allocation5], 256  }
  0x24   :  { %97 = vsyncadd [#allocation5], 4294967040 }
  0x25   :  { %46 = vsyncpa [#allocation4], 1 }
  0x26   :  { %47 = vsyncpa [#allocation5], 1 }

</bundles_post_ra>
